<compile_context>
chip_gen: v6e
topology: v6e:2x2x1
jax: 0.10.0
libtpu: 0.0.40
codegen_flags: <defaults>
</compile_context>

<pallas_src>
import math

import jax
import jax.numpy as jnp
from jax.experimental import pallas as pl
from jax.experimental.pallas import tpu as pltpu

LANE = 128
SUBLANE = 8
MAX_TILE_ROWS = 4096  # 4096 x 128 x 4 B = 2 MiB per block


def _cdiv(a, b):
    return -(-a // b)


# ----------------------------- Pallas kernel ------------------------------- #
def _ema_kernel(omd_ref, shadow_ref, param_ref, out_ref):
    # omd_ref: SMEM scalar-prefetch ref holding one_minus_decay, shape (1,)
    omd = omd_ref[0]
    s = shadow_ref[...]
    # shadow.sub_(one_minus_decay * (shadow - param))
    out_ref[...] = s - omd * (s - param_ref[...])


def _ema_update_packed(omd, shadow_packed, param_packed, tile_rows):
    """EMA elementwise update on the packed (rows, 128) f32 slab, in place."""
    rows, lanes = shadow_packed.shape
    assert lanes == LANE and rows % tile_rows == 0
    grid = (rows // tile_rows,)
    blk = pl.BlockSpec((tile_rows, LANE), lambda i, omd_ref: (i, 0))
    return pl.pallas_call(
        _ema_kernel,
        out_shape=jax.ShapeDtypeStruct((rows, LANE), jnp.float32),
        grid_spec=pltpu.PrefetchScalarGridSpec(
            num_scalar_prefetch=1,
            grid=grid,
            in_specs=[blk, blk],
            out_specs=pl.BlockSpec((tile_rows, LANE), lambda i, omd_ref: (i, 0)),
        ),
        # Call args are (omd, shadow, param): alias the shadow operand to output 0
        # so the update happens in place in HBM (pairs with jit donation below).
        input_output_aliases={1: 0},
        compiler_params=pltpu.CompilerParams(
            dimension_semantics=("parallel",),
            vmem_limit_bytes=32 * 1024 * 1024,
        ),
    )(omd, shadow_packed, param_packed)


# ------------------------------ packing glue -------------------------------- #
def _pack(param_list, rows):
    """Flatten + concat + zero-pad a list of arrays into a (rows, 128) f32 slab."""
    flats = [jnp.ravel(p).astype(jnp.float32) for p in param_list]
    flat = jnp.concatenate(flats) if len(flats) > 1 else flats[0]
    total = flat.shape[0]
    flat = jnp.pad(flat, (0, rows * LANE - total))
    return flat.reshape(rows, LANE)


def _make_step(names, tile_rows, rows):
    """Build the jitted per-step update (pack params + kernel + counter bump)."""

    def step(shadow_packed, param_list, num_updates, decay):
        use_nu = num_updates >= 0
        new_nu = jnp.where(use_nu, num_updates + 1, num_updates).astype(jnp.int32)
        nu_f = new_nu.astype(jnp.float32)
        dyn_decay = (1.0 + nu_f) / (10.0 + nu_f)
        eff_decay = jnp.where(use_nu, jnp.minimum(decay, dyn_decay), decay)
        omd = (1.0 - eff_decay).astype(jnp.float32).reshape((1,))
        param_packed = _pack(param_list, rows)
        new_shadow = _ema_update_packed(omd, shadow_packed, param_packed, tile_rows)
        return new_shadow, new_nu

    # Donate the packed shadow: together with input_output_aliases the update is
    # done in place in HBM (no second full-size shadow buffer).
    return jax.jit(step, donate_argnums=(0,))


# ------------------------------ LitEma (JAX) -------------------------------- #
class LitEma:
    """Functional JAX/Pallas port of LitEma (shadow kept packed on device)."""

    def __init__(self, params, decay=0.9999, use_num_updates=True):
        if decay < 0.0 or decay > 1.0:
            raise ValueError("Decay must be between 0 and 1")
        self.decay = jnp.float32(decay)
        self.num_updates = jnp.int32(0) if use_num_updates else jnp.int32(-1)

        self.names = sorted(params.keys())
        self.shapes = {k: tuple(params[k].shape) for k in self.names}
        self.sizes = [int(math.prod(self.shapes[k])) if self.shapes[k] else 1
                      for k in self.names]

        total = sum(self.sizes)
        rows8 = _cdiv(_cdiv(total, LANE), SUBLANE) * SUBLANE     # multiple of 8
        self.tile_rows = min(MAX_TILE_ROWS, max(rows8, SUBLANE))
        self.rows = _cdiv(rows8, self.tile_rows) * self.tile_rows

        # Shadow initialized as a (packed) clone of the model params, once.
        self.shadow_packed = _pack([params[k] for k in self.names], self.rows)
        self._step = _make_step(self.names, self.tile_rows, self.rows)
        self.collected_params = []

    def reset_num_updates(self):
        self.num_updates = jnp.int32(0)

    def __call__(self, params):
        param_list = [params[k] for k in self.names]
        new_shadow, new_nu = self._step(
            self.shadow_packed, param_list, self.num_updates, self.decay)
        self.shadow_packed = new_shadow
        self.num_updates = new_nu
        return self.shadow_packed  # packed; use copy_to()/shadow_params() for dict

    def shadow_params(self):
        """Unpack the packed shadow back into {name: array} (cold path)."""
        flat = self.shadow_packed.reshape(-1)
        out, off = {}, 0
        for n, sz in zip(self.names, self.sizes):
            out[n] = flat[off:off + sz].reshape(self.shapes[n])
            off += sz
        return out

    def copy_to(self):
        return self.shadow_params()

    def store(self, parameters):
        # JAX arrays are immutable; keeping references is equivalent to clone().
        self.collected_params = list(parameters)

    def restore(self, parameters=None):
        return list(self.collected_params)


# ---------------------------------- main ------------------------------------ #
if __name__ == "__main__":
    key = jax.random.PRNGKey(0)
    k0, k1, k2, k3, k4, k5, k6, k7 = jax.random.split(key, 8)

    # A small synthetic "model": one conv (OIHW weights) and one linear layer.
    model_params = {
        "conv.weight": jax.random.normal(k0, (4, 4, 3, 3), jnp.float32),
        "conv.bias": jax.random.normal(k1, (4,), jnp.float32),
        "linear.weight": jax.random.normal(k2, (32, 16), jnp.float32),
        "linear.bias": jax.random.normal(k3, (32,), jnp.float32),
    }

    ema = LitEma(model_params, decay=0.9999, use_num_updates=True)

    # Simulate one optimizer step: perturb the model params, then EMA-update.
    updated_params = {
        "conv.weight": model_params["conv.weight"]
        + 0.1 * jax.random.normal(k4, (4, 4, 3, 3), jnp.float32),
        "conv.bias": model_params["conv.bias"]
        + 0.1 * jax.random.normal(k5, (4,), jnp.float32),
        "linear.weight": model_params["linear.weight"]
        + 0.1 * jax.random.normal(k6, (32, 16), jnp.float32),
        "linear.bias": model_params["linear.bias"]
        + 0.1 * jax.random.normal(k7, (32,), jnp.float32),
    }

    ema(updated_params)                      # one EMA step (jitted, in-place)
    new_shadow = ema.copy_to()               # unpack for the check
    jax.block_until_ready(jax.tree_util.tree_leaves(new_shadow))

    # Pure-JAX reference check (num_updates == 1 -> decay = min(0.9999, 2/11)).
    ref_decay = min(0.9999, (1.0 + 1.0) / (10.0 + 1.0))
    one_minus_decay = 1.0 - ref_decay
    ok = int(ema.num_updates) == 1
    for k in model_params:
        ref = model_params[k] - one_minus_decay * (model_params[k] - updated_params[k])
        ok &= bool(jnp.allclose(new_shadow[k], ref, atol=1e-5, rtol=1e-5))
        ok &= new_shadow[k].shape == model_params[k].shape
        ok &= new_shadow[k].dtype == jnp.float32

    if ok:
        print("KERNEL_OK")
    else:
        raise SystemExit("EMA kernel mismatch vs reference")
</pallas_src>

<mosaic_0001>
module attributes {stable_mosaic.version = 11 : i64} {
  func.func @_ema_kernel(%arg0: i32, %arg1: memref<1xf32, #tpu.memory_space<smem>>, %arg2: memref<8x128xf32, #tpu.memory_space<vmem>>, %arg3: memref<8x128xf32, #tpu.memory_space<vmem>>, %arg4: memref<8x128xf32, #tpu.memory_space<vmem>>) attributes {dimension_semantics = [#tpu.dimension_semantics<parallel>], iteration_bounds = array<i64: 1>, scalar_prefetch = 1 : i64, scratch_operands = 0 : i64, tpu.core_type = #tpu.core_type<tc>, window_params = [{transform_indices = @transform_0, window_bounds = array<i64: 8, 128>}, {transform_indices = @transform_1, window_bounds = array<i64: 8, 128>}, {transform_indices = @transform_2, window_bounds = array<i64: 8, 128>}]} {
    %c0 = arith.constant 0 : index
    %0 = memref.load %arg1[%c0] : memref<1xf32, #tpu.memory_space<smem>>
    %c0_0 = arith.constant 0 : index
    %c0_1 = arith.constant 0 : index
    %1 = vector.load %arg2[%c0_0, %c0_1] : memref<8x128xf32, #tpu.memory_space<vmem>>, vector<8x128xf32>
    %c0_2 = arith.constant 0 : index
    %c0_3 = arith.constant 0 : index
    %2 = vector.load %arg3[%c0_2, %c0_3] : memref<8x128xf32, #tpu.memory_space<vmem>>, vector<8x128xf32>
    %3 = arith.subf %1, %2 : vector<8x128xf32>
    %4 = vector.broadcast %0 : f32 to vector<8x128xf32>
    %5 = arith.mulf %4, %3 : vector<8x128xf32>
    %6 = arith.subf %1, %5 : vector<8x128xf32>
    %c0_4 = arith.constant 0 : index
    %c0_5 = arith.constant 0 : index
    %7 = vector.load %arg4[%c0_4, %c0_5] : memref<8x128xf32, #tpu.memory_space<vmem>>, vector<8x128xf32>
    tpu.vector_store %arg4[%c0_4, %c0_5], %6 {strides = array<i32>} : memref<8x128xf32, #tpu.memory_space<vmem>>, vector<8x128xf32>,
    return
  }
  func.func @transform_0(%arg0: i32, %arg1: memref<1xf32, #tpu.memory_space<smem>>) -> (i32, i32) {
    %c0_i32 = arith.constant 0 : i32
    %c0_i32_0 = arith.constant 0 : i32
    return %arg0, %c0_i32 : i32, i32
  }
  func.func @transform_1(%arg0: i32, %arg1: memref<1xf32, #tpu.memory_space<smem>>) -> (i32, i32) {
    %c0_i32 = arith.constant 0 : i32
    %c0_i32_0 = arith.constant 0 : i32
    return %arg0, %c0_i32 : i32, i32
  }
  func.func @transform_2(%arg0: i32, %arg1: memref<1xf32, #tpu.memory_space<smem>>) -> (i32, i32) {
    %c0_i32 = arith.constant 0 : i32
    %c0_i32_0 = arith.constant 0 : i32
    return %arg0, %c0_i32 : i32, i32
  }
}

</mosaic_0001>

<bundles_post_ra>
// kernel: step.1
= control target key start
LH: loop header
LB: loop body
LE: loop exit
PB: predicated region body
PF: predicated region fallthrough
CT: control target
= control target key end

     0   :  { %s57_s0 = inlined_call_operand.<no memory space> [shape: f32[1], index: 0, kind: input, shape index: {}]   ;;  %s58_s1 = inlined_call_operand.vmem [shape: f32[8,128], index: 1, kind: input, shape index: {}, may-alias: {1,3}]   ;;  %s59_s2 = inlined_call_operand.vmem [shape: f32[8,128], index: 2, kind: input, shape index: {}]   ;;  %s60_s3 = inlined_call_operand.vmem [shape: f32[8,128], index: 3, kind: output, shape index: {}, may-alias: {1,3}]  }
   0x1   :  { %v14_v0 = vld [vmem:[%s58_s1] sm:$0xff]  ;;  %v17_v2 = vstv %s57_s0 }
   0x2   :  { %v15_v1 = vld [vmem:[%s59_s2] sm:$0xff] }
   0x3   :  { %v16_v3 = vsub.f32 %v14_v0, %v15_v1 }
   0x5   :  { %v18_v4 = vmul.f32 %v17_v2, %v16_v3 }
   0x7   :  { %v19_v5 = vsub.f32 %v14_v0, %v18_v4 }
   0x9   :  { %20 = vst [vmem:[%s60_s3] sm:$0xff] %v19_v5 }

</bundles_post_ra>
